<compile_context>
chip_gen: v7x
topology: tpu7x:2x2x1
jax: 0.10.0
libtpu: 0.0.40
codegen_flags: <defaults>
</compile_context>

<pallas_src>
import functools

import jax
import jax.numpy as jnp
from jax.experimental import pallas as pl
from jax.experimental.pallas import tpu as pltpu


def _dw1x1_act_pad_kernel(wb_ref, x_ref, o_ref, *, H, W, pad):
    """One grid step == one (n, c) image.

    wb_ref: (N*C, 3) f32 in SMEM, row i = (0.5*w[c], 0.5*b[c], border[c])
            with c = i % C and border[c] = tanh(2*sigmoid(b[c])).
    x_ref:  (1, H, W) VMEM tile (unpadded interior of image i).
    o_ref:  (1, H+2*pad, W+2*pad) VMEM tile (padded output image i).

    out = tanh(2*sigmoid(w*x + b)) = tanh(1 + tanh(0.5*w*x + 0.5*b)).
    In the zero-padded border the conv output is just b, so the activation
    there is the per-channel constant held in wb_ref[i, 2].
    """
    i = pl.program_id(0)
    w_half = wb_ref[i, 0]
    b_half = wb_ref[i, 1]
    border = wb_ref[i, 2]

    # Fill the whole padded block with the border constant (one full store).
    o_ref[...] = jnp.full(o_ref.shape, border, dtype=o_ref.dtype)

    # Overwrite the interior window.  The offset store only costs vst slots
    # (plenty of slack in a mem-bound kernel); the block is still written
    # back to HBM exactly once.
    y_half = x_ref[0] * w_half + b_half
    o_ref[0, pad:pad + H, pad:pad + W] = jnp.tanh(1.0 + jnp.tanh(y_half))


def model_forward(x, weight, bias, pad=3):
    """Conv2d(C,C,1,stride=1,padding=pad,groups=C) -> sigmoid -> *2 -> tanh.

    x: (N, C, H, W) f32; weight: (C,1,1,1) or (C,); bias: (C,).
    Returns (N, C, H+2*pad, W+2*pad) f32.
    """
    N, C, H, W = x.shape
    Hp, Wp = H + 2 * pad, W + 2 * pad
    NC = N * C

    w = weight.reshape(C).astype(x.dtype)
    b = bias.reshape(C).astype(x.dtype)

    # Row i = n*C + c of the (NC, H, W) view maps to channel c = i % C.
    # Pack (0.5*w, 0.5*b, border) per image into one tiny resident SMEM table.
    w_half = jnp.tile(0.5 * w, N)
    b_half = jnp.tile(0.5 * b, N)
    border = jnp.tanh(2.0 * jax.nn.sigmoid(jnp.tile(b, N)))  # value in zero-pad region
    wb = jnp.stack([w_half, b_half, border], axis=1)          # (NC, 3) f32

    x3d = x.reshape(NC, H, W)

    kernel = functools.partial(_dw1x1_act_pad_kernel, H=H, W=W, pad=pad)

    # Double-buffered (1,H,W) input + (1,Hp,Wp) output blocks per step.
    block_bytes = 4 * (H * W + Hp * Wp)
    vmem_limit = int(min(max(4 * block_bytes, 8 << 20), 32 << 20))

    out3d = pl.pallas_call(
        kernel,
        out_shape=jax.ShapeDtypeStruct((NC, Hp, Wp), x.dtype),
        grid=(NC,),
        in_specs=[
            # Whole per-channel scalar table, loaded once into SMEM.
            pl.BlockSpec(memory_space=pltpu.MemorySpace.SMEM),
            # One full image per grid step (block = full H, W extents).
            pl.BlockSpec((1, H, W), lambda i: (i, 0, 0)),
        ],
        out_specs=pl.BlockSpec((1, Hp, Wp), lambda i: (i, 0, 0)),
        compiler_params=pltpu.CompilerParams(
            dimension_semantics=("parallel",),   # megacore sharding on v7x
            vmem_limit_bytes=vmem_limit,
        ),
        cost_estimate=pl.CostEstimate(
            flops=2 * NC * H * W,
            transcendentals=2 * NC * H * W,
            bytes_accessed=4 * (NC * H * W + NC * Hp * Wp + 3 * NC),
        ),
    )(wb, x3d)

    return out3d.reshape(N, C, Hp, Wp)


if __name__ == "__main__":
    key = jax.random.PRNGKey(0)
    kx, kw, kb = jax.random.split(key, 3)

    # Small shapes consistent with the module (3 in / 3 out channels, groups=3).
    N, C, H, W = 2, 3, 32, 32
    pad = 3
    x = jax.random.normal(kx, (N, C, H, W), dtype=jnp.float32)
    weight = 0.5 * jax.random.normal(kw, (C, 1, 1, 1), dtype=jnp.float32)
    bias = 0.1 * jax.random.normal(kb, (C,), dtype=jnp.float32)

    out = jax.block_until_ready(model_forward(x, weight, bias, pad=pad))

    # Pure-JAX reference (same math as the PyTorch module).
    xp = jnp.pad(x, ((0, 0), (0, 0), (pad, pad), (pad, pad)))
    ref = jnp.tanh(2.0 * jax.nn.sigmoid(
        xp * weight.reshape(C)[None, :, None, None]
        + bias[None, :, None, None]))

    assert out.shape == (N, C, H + 2 * pad, W + 2 * pad), out.shape
    assert jnp.allclose(out, ref, atol=1e-5, rtol=1e-5), float(
        jnp.max(jnp.abs(out - ref)))
    print("KERNEL_OK")
</pallas_src>

<mosaic_0001>
module attributes {stable_mosaic.version = 11 : i64} {
  func.func @_dw1x1_act_pad_kernel(%arg0: i32, %arg1: memref<6x3xf32, #tpu.memory_space<smem>>, %arg2: memref<1x32x32xf32, #tpu.memory_space<vmem>>, %arg3: memref<1x38x38xf32, #tpu.memory_space<vmem>>) attributes {dimension_semantics = [#tpu.dimension_semantics<parallel>], iteration_bounds = array<i64: 6>, scalar_prefetch = 0 : i64, scratch_operands = 0 : i64, tpu.core_type = #tpu.core_type<tc>, window_params = [{transform_indices = @transform_0, window_bounds = array<i64: 6, 3>}, {transform_indices = @transform_1, window_bounds = array<i64: 1, 32, 32>}, {transform_indices = @transform_2, window_bounds = array<i64: 1, 38, 38>}]} {
    %0 = arith.index_cast %arg0 : i32 to index
    %c0 = arith.constant 0 : index
    %1 = memref.load %arg1[%0, %c0] : memref<6x3xf32, #tpu.memory_space<smem>>
    %2 = arith.index_cast %arg0 : i32 to index
    %c1 = arith.constant 1 : index
    %3 = memref.load %arg1[%2, %c1] : memref<6x3xf32, #tpu.memory_space<smem>>
    %4 = arith.index_cast %arg0 : i32 to index
    %c2 = arith.constant 2 : index
    %5 = memref.load %arg1[%4, %c2] : memref<6x3xf32, #tpu.memory_space<smem>>
    %6 = vector.broadcast %5 : f32 to vector<1x38x38xf32>
    %c0_0 = arith.constant 0 : index
    %c0_1 = arith.constant 0 : index
    %c0_2 = arith.constant 0 : index
    %7 = vector.load %arg3[%c0_0, %c0_1, %c0_2] : memref<1x38x38xf32, #tpu.memory_space<vmem>>, vector<1x38x38xf32>
    tpu.vector_store %arg3[%c0_0, %c0_1, %c0_2], %6 {strides = array<i32>} : memref<1x38x38xf32, #tpu.memory_space<vmem>>, vector<1x38x38xf32>,
    %c0_3 = arith.constant 0 : index
    %c0_4 = arith.constant 0 : index
    %c0_5 = arith.constant 0 : index
    %8 = vector.load %arg2[%c0_3, %c0_4, %c0_5] : memref<1x32x32xf32, #tpu.memory_space<vmem>>, vector<1x32x32xf32>
    %9 = vector.shape_cast %8 : vector<1x32x32xf32> to vector<32x32xf32>
    %10 = vector.broadcast %1 : f32 to vector<32x32xf32>
    %11 = arith.mulf %9, %10 : vector<32x32xf32>
    %12 = vector.broadcast %3 : f32 to vector<32x32xf32>
    %13 = arith.addf %11, %12 : vector<32x32xf32>
    %14 = math.tanh %13 : vector<32x32xf32>
    %cst = arith.constant 1.000000e+00 : f32
    %15 = vector.broadcast %cst : f32 to vector<32x32xf32>
    %16 = arith.addf %15, %14 : vector<32x32xf32>
    %17 = math.tanh %16 : vector<32x32xf32>
    %c0_6 = arith.constant 0 : index
    %c3 = arith.constant 3 : index
    %c3_7 = arith.constant 3 : index
    %18 = vector.load %arg3[%c0_6, %c3, %c3_7] : memref<1x38x38xf32, #tpu.memory_space<vmem>>, vector<1x32x32xf32>
    %19 = vector.shape_cast %18 : vector<1x32x32xf32> to vector<32x32xf32>
    %20 = vector.shape_cast %17 : vector<32x32xf32> to vector<1x32x32xf32>
    tpu.vector_store %arg3[%c0_6, %c3, %c3_7], %20 {strides = array<i32>} : memref<1x38x38xf32, #tpu.memory_space<vmem>>, vector<1x32x32xf32>,
    return
  }
  func.func @transform_0(%arg0: i32) -> (i32, i32) {
    %c0_i32 = arith.constant 0 : i32
    %c0_i32_0 = arith.constant 0 : i32
    %c0_i32_1 = arith.constant 0 : i32
    return %c0_i32, %c0_i32_0 : i32, i32
  }
  func.func @transform_1(%arg0: i32) -> (i32, i32, i32) {
    %c0_i32 = arith.constant 0 : i32
    %c0_i32_0 = arith.constant 0 : i32
    %c0_i32_1 = arith.constant 0 : i32
    return %arg0, %c0_i32, %c0_i32_0 : i32, i32, i32
  }
  func.func @transform_2(%arg0: i32) -> (i32, i32, i32) {
    %c0_i32 = arith.constant 0 : i32
    %c0_i32_0 = arith.constant 0 : i32
    %c0_i32_1 = arith.constant 0 : i32
    return %arg0, %c0_i32, %c0_i32_0 : i32, i32, i32
  }
}

</mosaic_0001>

<bundles_post_ra>
// kernel: tpu_custom_call.1
= control target key start
LH: loop header
LB: loop body
LE: loop exit
PB: predicated region body
PF: predicated region fallthrough
CT: control target
= control target key end

     0   :  { %7 = vsyncpa [#allocation5], 0  ;;  %s772_s0 = inlined_call_operand.vmem [shape: f32[6,3], index: 0, kind: input, shape index: {}]   ;;  %s773_s1 = inlined_call_operand.hbm [shape: f32[6,32,32], index: 1, kind: input, shape index: {}]   ;;  %s774_s2 = inlined_call_operand.hbm [shape: f32[6,38,38], index: 2, kind: output, shape index: {}]  }
   0x1   :  { %8 = vsyncpa [#allocation3], 0 }
   0x2   :  { %10 = vsyncpa [#allocation3 + $0x1], 0 }
   0x3   :  { %11 = vsyncpa [#allocation4], 0 }
   0x4   :  { %13 = vsyncpa [#allocation4 + $0x1], 0  ;;  %s571_s9 = smov 0   ;;  %s573_s10 = smov 0  }
   0x5   :  { %s575_s11 = smov 0   ;;  %s577_s12 = smov 0  }
   0x6 LB: > { %s592_s13 = sadd.s32 4294967295, %s546_s12   ;;  %s336_s14 = sadd.s32 4294967294, %s546_s12   ;;  %s546_s12 = sphi %s577_s12, %s793_s12   ;;  %s542_s11 = sphi %s575_s11, %s792_s11   ;;  %s538_s10 = sphi %s573_s10, %s791_s10   ;;  %s534_s9 = sphi %s571_s9, %s790_s9  }
   0x7   : > { %s596_s15 = sadd.s32 1, %s546_s12   ;;  %s47_s16 = sadd.s32 1, %s542_s11 }
   0x8   : > { %s44_s17 = ssub.s32 %s546_s12, %s596_s15  ;;  %p54_p0 = scmp.ne.s32.totalorder %s542_s11, %s538_s10 }
   0x9   : > { %p45_p1 = scmp.eq.s32.totalorder %s44_s17, 0  ;;  %p55_p2 = scmp.eq.s32.totalorder %s546_s12, 0 }
   0xa   : > { %p60_p3 = scmp.ne.s32.totalorder %s538_s10, %s534_s9  ;;  %p776_p4 = scmp.eq.s32.totalorder %s592_s13, 0 }
   0xb   : > { %s608_s18 = scalar_select %p45_p1, %s542_s11, %s47_s16  }
   0xc   : > { %p610_p5 = por %p55_p2, %p54_p0  ;;  %p616_p6 = por %p776_p4, %p60_p3 }
   0xd   : > { %p84_p7 = scmp.eq.s32.totalorder %s592_s13, 5  ;;  %p90_p8 = scmp.eq.s32.totalorder %s336_s14, 5 }
   0xe   : > { %s779_s20 = scalar_select %p616_p6, 1, 0 }
   0xf   : > { %p337_p9 = scmp.ge.s32.totalorder %s546_s12, 1  ;;  %p97_p10 = scmp.lt.s32.totalorder %s546_s12, 7 }
  0x10   : > { %p623_p11 = por %p84_p7, %p54_p0  ;;  %p627_p12 = por %p90_p8, %p60_p3 }
  0x11   : > { %p631_p13 = pnand %p337_p9, %p97_p10  ;;  %s110_s26 = sshll.u32 %s772_s0, 4  ;;  %s111_s26 = int_to_ptr.vmem [resolvable:$true] %s110_s26 }
  0x12   : > { %s780_s21 = scalar_select %p623_p11, 1, 0 }
  0x13   : > { %s781_s22 = scalar_select %p627_p12, 1, 0 }
  0x14   : > { %p361_p1 = pneg %p631_p13  ;;  %p374_p0 = scmp.lt.s32.totalorder %s546_s12, 6 }
  0x15   : > { %s121_s28 = sand.u32 1, %s542_s11   ;;  %s431_s3 = scalar_lea.vmem %s111_s26, 128 }
  0x16   : > { %p643_p2 = pnand %p361_p1, %p776_p4  ;;  %p650_p3 = pnand %p374_p0, %p610_p5 }
  0x17   : > { %s340_s30 = sshll.u32 %s121_s28, 5  ;;  %p432_p7 = scmp.ne.s32.totalorder %s111_s26, %s431_s3 }
  0x18   : > { %p433_p8 = pneg %p643_p2  ;;  %p439_p12 = scmp.lt.s32.totalorder %s111_s26, %s111_s26 }
  0x19   : > { %p440_p11 = scmp.lt.s32.totalorder %s431_s3, %s431_s3 }
  0x1a   : > { %p434_p9 = pnand %p433_p8, %p432_p7 }
  0x1b   : > { %p441_p1 = por %p440_p11, %p439_p12 }
  0x1c   : > { %p435_p10 = pneg %p434_p9 }
  0x1e   : > { %p442_p4 = pnand %p441_p1, %p435_p10 }
  0x20   : > { %445 = shalt.err (!%p442_p4)
}
  0x21   : > { %s548_s4 = smov [#allocation2]   ;;  %s350_s5 = sshll.u32 %s546_s12, 9 }
  0x22   : > { %364 = dma.vmem_to_smem (!%p643_p2), %s111_s26, 128, %s548_s4, [#allocation5]  }
  0x23   : > { %s125_s6 = scalar_lea.vmem [#allocation6], %s340_s30  ;;  %s662_s16 = scalar_lea.hbm %s773_s1, %s350_s5 }
  0x24   : > { %s132_s7 = sshll.u32 %s125_s6, 4  ;;  %s666_s17 = scalar_lea.sflag [#allocation3], %s121_s28  ;;  %s664_s7 = int_to_ptr.vmem [resolvable:$true] %s132_s7 }
  0x25   : > { %s446_s19 = scalar_lea.hbm %s662_s16, 512  ;;  %p448_p5 = pneg %p650_p3 }
  0x26   : > { %p447_p4 = scmp.ne.s32.totalorder %s662_s16, %s446_s19  ;;  %s451_s26 = scalar_lea.hbm %s773_s1, 3072 }
  0x27   : > { %p452_p0 = scmp.lt.u32.totalorder %s662_s16, %s773_s1  ;;  %p453_p2 = scmp.lt.u32.totalorder %s451_s26, %s446_s19 }
  0x28   : > { %p449_p11 = pnand %p448_p5, %p447_p4  ;;  %p455_p8 = scmp.lt.u32.totalorder %s446_s19, %s662_s16 }
  0x29   : > { %p454_p7 = por %p453_p2, %p452_p0 }
  0x2a   : > { %p450_p12 = pneg %p449_p11 }
  0x2b   : > { %p456_p9 = por %p455_p8, %p454_p7 }
  0x2d   : > { %p457_p10 = pnand %p456_p9, %p450_p12 }
  0x2f   : > { %460 = shalt.err (!%p457_p10)
}
  0x30   : > { %s461_s28 = scalar_lea.vmem %s664_s7, 512  ;;  %s549_s3 = smov [#allocation6]  }
  0x31   : > { %p462_p1 = scmp.ne.s32.totalorder %s664_s7, %s461_s28  ;;  %s466_s4 = sshll.u32 %s549_s3, 4  ;;  %s467_s4 = int_to_ptr.vmem [resolvable:$false] %s466_s4 }
  0x32   : > { %s468_s5 = scalar_lea.vmem %s467_s4, 1024  ;;  %p469_p6 = scmp.lt.s32.totalorder %s664_s7, %s467_s4 }
  0x33   : > { %p464_p4 = pnand %p462_p1, %p448_p5  ;;  %p470_p0 = scmp.lt.s32.totalorder %s468_s5, %s461_s28 }
  0x35   : > { %p465_p11 = pneg %p464_p4  ;;  %p471_p2 = por %p470_p0, %p469_p6 }
  0x37   : > { %p472_p7 = pnand %p471_p2, %p465_p11 }
  0x39   : > { %475 = shalt.err (!%p472_p7)
}
  0x3a   : > { %s550_s6 = smov 128   ;;  %s551_s8 = smov 8  }
  0x3b   : > { %368 = dma.hbm_to_vmem [thread:$0]  (!%p650_p3), %s662_s16, 512, %s664_s7, %s666_s17, %s550_s6, %s550_s6, %s551_s8  }
  0x3c   : > { %144 = sbr.rel (%p631_p13) target bundleno = 247 (0xf7), region = 28  ;;  %p785_p5 = scmp.eq.s32.totalorder (!%p631_p13), %s592_s13, 0 }
  0x43   : > { %521 = dma.done.wait (%p785_p5), [#allocation5], 128   ;;  %p786_p12 = pmov %p785_p5 }
  0x44   : > { %s701_s14 = sand.u32 1, %s538_s10   ;;  %p787_p6 = scmp.ne.s32.totalorder %s779_s20, 0 }
  0x45   : > { %523 = vsyncadd (%p786_p12), [#allocation5], 4294967168  ;;  %s345_s19 = sshll.u32 %s701_s14, 5  ;;  %s151_s24 = scalar_lea.sflag [#allocation3], %s701_s14 }
  0x46   : > { %s154_s25 = scalar_lea.vmem [#allocation6], %s345_s19 }
  0x47   : > { %525 = dma.done.wait (%p787_p6), %s151_s24, 512  }
  0x48   : > { %527 = vsyncadd (%p787_p6), %s151_s24, 4294966784 }
  0x49   : > { %159 = sfence }
  0x4a   : > { %s346_s23 = sshll.u32 %s592_s13, 7  ;;  %v191_v0 = vld [vmem:[%s154_s25 + $0x8] sm:$0xff]  ;;  %v192_v1 = vld [vmem:[%s154_s25 + $0x10] sm:$0xff]  ;;  %v193_v2 = vld [vmem:[%s154_s25 + $0x18] sm:$0xff]  ;;  %vm183_vm0 = vcmask 310272   ;;  %s351_s26 = smul.u32 40, %s701_s14 }
  0x4b   : > { %s177_s29 = sld [smem:[#allocation2 + %s346_s23]]  ;;  %s178_s7 = sadd.s32 1, %s346_s23  ;;  %v190_v3 = vld [vmem:[%s154_s25] sm:$0xff]  ;;  %vm188_vm1 = vcmask 308224   ;;  %vm232_vm2 = vcmask 285720  }
  0x4c   : > { %s179_s16 = sld [smem:[#allocation2 + %s178_s7]]  ;;  %s180_s20 = sadd.s32 2, %s346_s23 }
  0x4d   : > { %s181_s17 = sld [smem:[#allocation2 + %s180_s20]]  ;;  %s711_s27 = scalar_lea.vmem [#allocation7], %s351_s26 }
  0x4e   : > { %s552_s30 = smov 3   ;;  %s352_s28 = smul.u32 640, %s592_s13 }
  0x4f   : > { %s251_s3 = sshll.u32 %s711_s27, 4  ;;  %s238_s8 = scalar_lea.sflag [#allocation4], %s701_s14  ;;  %s728_s3 = int_to_ptr.vmem [resolvable:$true] %s251_s3 }
  0x50   : > { %s726_s6 = scalar_lea.hbm %s774_s2, %s352_s28  ;;  %s476_s19 = scalar_lea.vmem %s728_s3, 640 }
  0x51   : > { %v194_v4 = vstv %s177_s29  ;;  %p477_p13 = scmp.ne.s32.totalorder %s728_s3, %s476_s19  ;;  %p788_p3 = scmp.ne.s32.totalorder %s780_s21, 0 }
  0x52   : > { %v197_v5 = vmul.f32 %v194_v4, %v192_v1  ;;  %v198_v6 = vmul.f32 %v194_v4, %v193_v2  ;;  %v199_v7 = vstv %s179_s16  ;;  %v196_v8 = vmul.f32 %v194_v4, %v191_v0  ;;  %s553_s13 = smov [#allocation7]  }
  0x53   : > { %v195_v9 = vmul.f32 %v194_v4, %v190_v3  ;;  %v182_v15 = vstv %s181_s17  ;;  %p478_p8 = pnand %p477_p13, %p788_p3  ;;  %s480_s24 = sshll.u32 %s553_s13, 4  ;;  %s481_s24 = int_to_ptr.vmem [resolvable:$false] %s480_s24 }
  0x54   : > { %v202_v10 = vadd.f32 %v199_v7, %v197_v5  ;;  %v203_v11 = vadd.f32 %v199_v7, %v198_v6  ;;  %v201_v12 = vadd.f32 %v199_v7, %v196_v8  ;;  %186 = vst.msk [vmem:[%s711_s27 + $0x10] sm:$0xff] %vm183_vm0, %v182_v15  ;;  %187 = vst.msk [vmem:[%s711_s27 + $0x18] sm:$0xff] %vm183_vm0, %v182_v15  ;;  %s482_s25 = scalar_lea.vmem %s481_s24, 1280  ;;  %p483_p10 = scmp.lt.s32.totalorder %s728_s3, %s481_s24 }
  0x55   : > { %v200_v13 = vadd.f32 %v199_v7, %v195_v9  ;;  %184 = vst.msk [vmem:[%s711_s27] sm:$0xff] %vm183_vm0, %v182_v15  ;;  %185 = vst.msk [vmem:[%s711_s27 + $0x8] sm:$0xff] %vm183_vm0, %v182_v15  ;;  %p479_p9 = pneg %p478_p8  ;;  %p484_p1 = scmp.lt.s32.totalorder %s482_s25, %s476_s19 }
  0x56   : > { %415 = vtanh.f32 %v202_v10  ;;  %189 = vst.msk [vmem:[%s711_s27 + $0x20] sm:$0x3f] %vm188_vm1, %v182_v15 }
  0x57   : > { %417 = vtanh.f32 %v203_v11  ;;  %p485_p4 = por %p484_p1, %p483_p10 }
  0x58   : > { %419 = vtanh.f32 %v201_v12 }
  0x59   : > { %421 = vtanh.f32 %v200_v13  ;;  %p486_p11 = pnand %p485_p4, %p479_p9 }
  0x60   : > { %v416_v14 = vpop.eup %415 }
  0x61   : > { %v418_v16 = vpop.eup %417  ;;  %v210_v17 = vadd.f32 1.0, %v416_v14 }
  0x62   : > { %v420_v18 = vpop.eup %419  ;;  %v211_v19 = vadd.f32 1.0, %v418_v16 }
  0x63   : > { %v422_v20 = vpop.eup %421  ;;  %423 = vtanh.f32 %v210_v17  ;;  %v209_v22 = vadd.f32 1.0, %v420_v18 }
  0x64   : > { %v208_v21 = vadd.f32 1.0, %v422_v20  ;;  %425 = vtanh.f32 %v211_v19 }
  0x66   : > { %427 = vtanh.f32 %v208_v21 }
  0x67   : > { %429 = vtanh.f32 %v209_v22 }
  0x6d   : > { %v424_v23 = vpop.eup %423 }
  0x6e   : > { %224 = vrot.lane.b32.xlu1 %v424_v23, %s552_s30  ;;  %v426_v24 = vpop.eup %425 }
  0x70   : > { %v428_v25 = vpop.eup %427 }
  0x71   : > { %220 = vrot.lane.b32.xlu0 %v428_v25, %s552_s30  ;;  %v430_v26 = vpop.eup %429 }
  0x72   : > { %226 = vrot.lane.b32.xlu1 %v426_v24, %s552_s30 }
  0x75   : > { %222 = vrot.lane.b32.xlu0 %v430_v26, %s552_s30 }
  0xe0   : > { %v225_v27 = vpop.permute.xlu1 %224 }
  0xe1   : > { %235 = vst.msk [vmem:[%s711_s27 + $0x13] sm:$0xff] %vm232_vm2, %v225_v27 }
  0xe3   : > { %v221_v28 = vpop.permute.xlu0 %220 }
  0xe4   : > { %233 = vst.msk [vmem:[%s711_s27 + $0x3] sm:$0xff] %vm232_vm2, %v221_v28  ;;  %v227_v29 = vpop.permute.xlu1 %226 }
  0xe5   : > { %236 = vst.msk [vmem:[%s711_s27 + $0x1b] sm:$0xff] %vm232_vm2, %v227_v29 }
  0xe7   : > { %v223_v30 = vpop.permute.xlu0 %222 }
  0xe8   : > { %234 = vst.msk [vmem:[%s711_s27 + $0xb] sm:$0xff] %vm232_vm2, %v223_v30 }
  0xe9   : > { %489 = shalt.err (!%p486_p11)
}
  0xea   : > { %s490_s23 = scalar_lea.hbm %s726_s6, 640  ;;  %s494_s16 = scalar_lea.hbm %s774_s2, 3840 }
  0xeb   : > { %p491_p0 = scmp.ne.s32.totalorder %s726_s6, %s490_s23  ;;  %p495_p5 = scmp.lt.u32.totalorder %s726_s6, %s774_s2 }
  0xec   : > { %p496_p12 = scmp.lt.u32.totalorder %s494_s16, %s490_s23  ;;  %p498_p13 = scmp.lt.u32.totalorder %s490_s23, %s726_s6 }
  0xed   : > { %p492_p2 = pnand %p491_p0, %p788_p3 }
  0xee   : > { %p497_p6 = por %p496_p12, %p495_p5 }
  0xef   : > { %p493_p7 = pneg %p492_p2 }
  0xf0   : > { %p499_p8 = por %p498_p13, %p497_p6 }
  0xf2   : > { %p500_p9 = pnand %p499_p8, %p493_p7 }
  0xf4   : > { %503 = shalt.err (!%p500_p9)
}
  0xf5   : > { %s554_s26 = smov 128   ;;  %s555_s27 = smov 8  }
  0xf6   : > { %359 = dma.vmem_to_hbm [thread:$0]  (%p788_p3), %s728_s3, 640, %s726_s6, %s238_s8, %s554_s26, %s554_s26, %s555_s27  }
  0xf7 PF: > { %p376_p10 = scmp.ge.s32.totalorder %s546_s12, 2  ;;  %s266_s30 = sand.u32 1, %s534_s9  }
  0xf8   : > { %p789_p1 = scmp.ne.s32.totalorder %s781_s22, 0  ;;  %s267_s28 = scalar_lea.sflag [#allocation4], %s266_s30 }
  0xfa   : > { %p370_p4 = pnand %p376_p10, %p789_p1 }
  0xfc   : > { %529 = dma.done.wait (!%p370_p4), %s267_s28, 640  }
  0xfd   : > { %531 = vsyncadd (!%p370_p4), %s267_s28, 4294966656  ;;  %p16_p11 = scmp.ge.s32.totalorder %s596_s15, 8   ;;  %s790_s9 = smov %s538_s10 }
  0xfe   : > { %s791_s10 = smov %s542_s11  ;;  %s792_s11 = smov %s608_s18 }
  0xff   : > { %s793_s12 = smov %s596_s15  ;;  %18 = sbr.rel (!%p16_p11) target bundleno = 6 (0x6), region = 78 }
 0x106   :  { %272 = vsyncpa [#allocation3], 1 }
 0x107   :  { %274 = vsyncpa [#allocation3 + $0x1], 1 }
 0x108   :  { %275 = vsyncpa [#allocation4], 1 }
 0x109   :  { %277 = vsyncpa [#allocation4 + $0x1], 1 }
 0x10a   :  { %278 = vsyncpa [#allocation5], 1 }
 0x10b   :  { %280 = vsyncpa [#allocation5 + $0x1], 1 }

</bundles_post_ra>
